<compile_context>
chip_gen: v7x
topology: tpu7x:2x2x1
jax: 0.10.0
libtpu: 0.0.40
codegen_flags: <defaults>
</compile_context>

<pallas_src>
import jax
import jax.numpy as jnp
from jax import lax
from jax.experimental import pallas as pl
from jax.experimental.pallas import tpu as pltpu


def piven_kernel(x_ref, w_ref, b_ref, o_ref):
    # x_ref: (TILE_B, H), w_ref: (H, 3), b_ref: (1, 3), o_ref: (TILE_B, 3)
    x = x_ref[...]
    w = w_ref[...]
    b = b_ref[...].astype(jnp.float32)
    # MXU matmul with f32 accumulation (works for f32 or bf16 inputs).
    y = jnp.dot(x, w, preferred_element_type=jnp.float32) + b  # (TILE_B, 3) f32
    # Sigmoid only on the last column (the "v" head).  The exp goes to the EUP
    # slot, which is free under the DMA bottleneck.
    col = lax.broadcasted_iota(jnp.int32, y.shape, 1)
    o_ref[...] = jnp.where(col == 2, jax.nn.sigmoid(y), y).astype(o_ref.dtype)


def _round_up(n, m):
    return ((n + m - 1) // m) * m


def _sublane_multiple(dtype):
    itemsize = jnp.dtype(dtype).itemsize
    if itemsize >= 4:
        return 8
    if itemsize == 2:
        return 16
    return 32


def _vmem_capacity_bytes():
    # Generation-aware VMEM capacity (64 MiB/TC on v7x, 128 MiB on v5e/v6e).
    try:
        return int(pltpu.get_tpu_info().vmem_capacity_bytes)
    except Exception:
        return 64 * 1024 * 1024  # conservative default, safe on every gen


def piven_forward(x, w_fused, b_fused, *, tile_b=None):
    """PIVEN head forward.  x: (B, H); w_fused: (H, 3); b_fused: (3,) -> (B, 3)."""
    B, H = x.shape
    out_dtype = x.dtype
    x_it = jnp.dtype(x.dtype).itemsize
    w_it = jnp.dtype(w_fused.dtype).itemsize
    b_it = jnp.dtype(b_fused.dtype).itemsize
    o_it = jnp.dtype(out_dtype).itemsize
    b2d = b_fused.reshape(1, 3)

    sub = _sublane_multiple(x.dtype)           # dtype-aware sublane granularity
    b_cap = _round_up(max(B, 1), sub)          # never tile beyond (padded) batch

    # --- VMEM model (lane-padded footprints): x last dim pads to mult of 128,
    #     the narrow (.,3) weight/bias/output blocks occupy 128 lanes each.
    vmem_cap = _vmem_capacity_bytes()
    usable = int(vmem_cap * 0.70)              # headroom for compiler scratch
    H_lanes = _round_up(H, 128)
    resident = 2 * _round_up(H, 8) * 128 * w_it + 2 * 8 * 128 * b_it
    per_row_vmem = 2 * (H_lanes * x_it + 128 * o_it)   # double-buffered x + out

    if tile_b is None:
        # Target a few MiB of *actual* x bytes per tile so the ~0.35us/step
        # grid overhead is amortized, bounded by what fits in VMEM.
        x_buf_budget = max(4 << 20, min(24 << 20, usable // 5))
        by_budget = x_buf_budget // max(1, H * x_it)
        by_vmem = max(sub, (usable - resident) // max(1, per_row_vmem))
        tile_b = min(by_budget, by_vmem, b_cap)
        tile_b = max(sub, (int(tile_b) // sub) * sub)
        # Megacore (v7x): ensure >= 2 grid iterations whenever the batch allows,
        # so the "parallel" axis can shard across both TensorCores.  Costs at
        # most one extra ~0.35us grid step on single-TC chips.
        if pl.cdiv(B, tile_b) < 2 and B > sub:
            tile_b = _round_up(pl.cdiv(B, 2), sub)
    else:
        tile_b = max(sub, (int(tile_b) // sub) * sub)
        tile_b = min(tile_b, b_cap)

    # Ragged final block is handled by Pallas masking; no host-side pad copy.
    grid_b = pl.cdiv(B, tile_b)

    vmem_need = (
        2 * tile_b * H_lanes * x_it            # x double buffer (lane padded)
        + 2 * tile_b * 128 * o_it              # out double buffer (lane padded)
        + resident                             # weight + bias (lane padded)
    )
    vmem_limit = int(min(max(vmem_need + vmem_need // 4 + (2 << 20), 4 << 20),
                         vmem_cap))

    cost = pl.CostEstimate(
        flops=2 * B * H * 3,
        transcendentals=B,
        bytes_accessed=B * H * x_it + H * 3 * w_it + B * 3 * o_it,
    )

    def make_call(single_buffer_residents):
        resident_kw = (
            dict(pipeline_mode=pl.Buffered(1)) if single_buffer_residents else {}
        )
        return pl.pallas_call(
            piven_kernel,
            out_shape=jax.ShapeDtypeStruct((B, 3), out_dtype),
            grid_spec=pltpu.PrefetchScalarGridSpec(
                num_scalar_prefetch=0,
                grid=(grid_b,),
                in_specs=[
                    pl.BlockSpec((tile_b, H), lambda i: (i, 0)),            # stream x
                    pl.BlockSpec((H, 3), lambda i: (0, 0), **resident_kw),  # resident W
                    pl.BlockSpec((1, 3), lambda i: (0, 0), **resident_kw),  # resident b
                ],
                out_specs=pl.BlockSpec((tile_b, 3), lambda i: (i, 0)),
            ),
            compiler_params=pltpu.CompilerParams(
                dimension_semantics=("parallel",),  # independent batch tiles
                vmem_limit_bytes=vmem_limit,
            ),
            cost_estimate=cost,
        )

    try:
        # Weight/bias never change across the grid -> single-buffer them to
        # halve their VMEM footprint (matters at large H, esp. on v7x).
        return make_call(True)(x, w_fused, b2d)
    except Exception:
        # Fallback for JAX versions where Buffered(1) residents are rejected.
        return make_call(False)(x, w_fused, b2d)


def init_piven_params(hidden_dim, key):
    """Deterministic init matching PyTorch nn.Linear default ranges
    (uniform in +/- 1/sqrt(hidden_dim))."""
    k1, k2, k3, k4 = jax.random.split(key, 4)
    bound = 1.0 / jnp.sqrt(jnp.float32(hidden_dim))
    # linear1: (2, H) weight, (2,) bias ; linear2: (1, H) weight, (1,) bias
    w1 = jax.random.uniform(k1, (2, hidden_dim), jnp.float32, -bound, bound)
    b1 = jax.random.uniform(k2, (2,), jnp.float32, -bound, bound)
    w2 = jax.random.uniform(k3, (1, hidden_dim), jnp.float32, -bound, bound)
    b2 = jax.random.uniform(k4, (1,), jnp.float32, -bound, bound)
    # fuse: columns [0,1] = interval head, column [2] = value head
    w_fused = jnp.concatenate([w1, w2], axis=0).T  # (H, 3)
    b_fused = jnp.concatenate([b1, b2], axis=0)    # (3,)
    return w_fused, b_fused


def piven_reference(x, w_fused, b_fused):
    y = x.astype(jnp.float32) @ w_fused.astype(jnp.float32) + b_fused.astype(jnp.float32)
    interval = y[:, :2]
    v = jax.nn.sigmoid(y[:, 2:3])
    return jnp.concatenate([interval, v], axis=1).astype(x.dtype)


if __name__ == "__main__":
    key = jax.random.PRNGKey(0)
    kx, kp, kx2 = jax.random.split(key, 3)

    batch, hidden = 8, 32
    x = jax.random.normal(kx, (batch, hidden), jnp.float32)
    w_fused, b_fused = init_piven_params(hidden, kp)

    out = jax.block_until_ready(piven_forward(x, w_fused, b_fused))
    ref = piven_reference(x, w_fused, b_fused)
    assert out.shape == (batch, 3), out.shape
    assert jnp.allclose(out, ref, atol=1e-5, rtol=1e-5), "mismatch vs reference"

    # Ragged batch (B not a multiple of tile_b): no host-side padding copy,
    # Pallas masks the final partial block.
    batch2 = 37
    x2 = jax.random.normal(kx2, (batch2, hidden), jnp.float32)
    out2 = jax.block_until_ready(piven_forward(x2, w_fused, b_fused, tile_b=16))
    ref2 = piven_reference(x2, w_fused, b_fused)
    assert out2.shape == (batch2, 3), out2.shape
    assert jnp.allclose(out2, ref2, atol=1e-5, rtol=1e-5), "ragged mismatch"

    # bf16 path exercises the dtype-aware (16-row sublane) tiling + grid>=2 split.
    xb = x2.astype(jnp.bfloat16)
    wb = w_fused.astype(jnp.bfloat16)
    bb = b_fused.astype(jnp.bfloat16)
    out3 = jax.block_until_ready(piven_forward(xb, wb, bb))
    ref3 = piven_reference(x2, w_fused, b_fused)
    assert out3.shape == (batch2, 3), out3.shape
    assert jnp.allclose(out3.astype(jnp.float32), ref3, atol=5e-2, rtol=5e-2), \
        "bf16 mismatch"

    print("KERNEL_OK")
</pallas_src>

<mosaic_0001>
module attributes {stable_mosaic.version = 11 : i64} {
  func.func @piven_kernel(%arg0: i32, %arg1: memref<8x32xf32, #tpu.memory_space<vmem>>, %arg2: memref<32x3xf32, #tpu.memory_space<vmem>>, %arg3: memref<1x3xf32, #tpu.memory_space<vmem>>, %arg4: memref<8x3xf32, #tpu.memory_space<vmem>>) attributes {dimension_semantics = [#tpu.dimension_semantics<parallel>], iteration_bounds = array<i64: 1>, scalar_prefetch = 0 : i64, scratch_operands = 0 : i64, tpu.core_type = #tpu.core_type<tc>, window_params = [{transform_indices = @transform_0, window_bounds = array<i64: 8, 32>}, {pipeline_mode = #tpu.pipeline_mode<synchronous>, transform_indices = @transform_1, window_bounds = array<i64: 32, 3>}, {pipeline_mode = #tpu.pipeline_mode<synchronous>, transform_indices = @transform_2, window_bounds = array<i64: 1, 3>}, {transform_indices = @transform_3, window_bounds = array<i64: 8, 3>}]} {
    %c0 = arith.constant 0 : index
    %c0_0 = arith.constant 0 : index
    %0 = vector.load %arg1[%c0, %c0_0] : memref<8x32xf32, #tpu.memory_space<vmem>>, vector<8x32xf32>
    %c0_1 = arith.constant 0 : index
    %c0_2 = arith.constant 0 : index
    %1 = vector.load %arg2[%c0_1, %c0_2] : memref<32x3xf32, #tpu.memory_space<vmem>>, vector<32x3xf32>
    %c0_3 = arith.constant 0 : index
    %c0_4 = arith.constant 0 : index
    %2 = vector.load %arg3[%c0_3, %c0_4] : memref<1x3xf32, #tpu.memory_space<vmem>>, vector<1x3xf32>
    %cst = arith.constant dense<0.000000e+00> : vector<8x3xf32>
    %3 = tpu.matmul %0, %1, %cst {dimension_numbers = #tpu.dot_dimension_numbers<[1], [0], [0], [1], [0, 0, 1, 1], [], []>} : vector<8x32xf32>, vector<32x3xf32>, vector<8x3xf32> -> vector<8x3xf32>
    %4 = vector.broadcast %2 : vector<1x3xf32> to vector<8x3xf32>
    %5 = arith.addf %3, %4 : vector<8x3xf32>
    %6 = tpu.iota {dimensions = array<i32: 1>} : vector<8x3xi32>
    %c2_i32 = arith.constant 2 : i32
    %7 = vector.broadcast %c2_i32 : i32 to vector<8x3xi32>
    %8 = arith.cmpi eq, %6, %7 : vector<8x3xi32>
    %9 = arith.negf %5 : vector<8x3xf32>
    %10 = math.exp %9 : vector<8x3xf32>
    %cst_5 = arith.constant 1.000000e+00 : f32
    %11 = vector.broadcast %cst_5 : f32 to vector<8x3xf32>
    %12 = arith.addf %11, %10 : vector<8x3xf32>
    %13 = arith.divf %11, %12 : vector<8x3xf32>
    %14 = arith.select %8, %13, %5 : vector<8x3xi1>, vector<8x3xf32>
    %c0_6 = arith.constant 0 : index
    %c0_7 = arith.constant 0 : index
    %15 = vector.load %arg4[%c0_6, %c0_7] : memref<8x3xf32, #tpu.memory_space<vmem>>, vector<8x3xf32>
    tpu.vector_store %arg4[%c0_6, %c0_7], %14 {strides = array<i32>} : memref<8x3xf32, #tpu.memory_space<vmem>>, vector<8x3xf32>,
    return
  }
  func.func @transform_0(%arg0: i32) -> (i32, i32) {
    %c0_i32 = arith.constant 0 : i32
    %c0_i32_0 = arith.constant 0 : i32
    return %arg0, %c0_i32 : i32, i32
  }
  func.func @transform_1(%arg0: i32) -> (i32, i32) {
    %c0_i32 = arith.constant 0 : i32
    %c0_i32_0 = arith.constant 0 : i32
    %c0_i32_1 = arith.constant 0 : i32
    return %c0_i32, %c0_i32_0 : i32, i32
  }
  func.func @transform_2(%arg0: i32) -> (i32, i32) {
    %c0_i32 = arith.constant 0 : i32
    %c0_i32_0 = arith.constant 0 : i32
    %c0_i32_1 = arith.constant 0 : i32
    return %c0_i32, %c0_i32_0 : i32, i32
  }
  func.func @transform_3(%arg0: i32) -> (i32, i32) {
    %c0_i32 = arith.constant 0 : i32
    %c0_i32_0 = arith.constant 0 : i32
    return %arg0, %c0_i32 : i32, i32
  }
}

module attributes {stable_mosaic.version = 11 : i64} {
  func.func @piven_kernel(%arg0: i32, %arg1: memref<8x32xf32, #tpu.memory_space<vmem>>, %arg2: memref<32x3xf32, #tpu.memory_space<vmem>>, %arg3: memref<1x3xf32, #tpu.memory_space<vmem>>, %arg4: memref<8x3xf32, #tpu.memory_space<vmem>>) attributes {dimension_semantics = [#tpu.dimension_semantics<parallel>], iteration_bounds = array<i64: 1>, scalar_prefetch = 0 : i64, scratch_operands = 0 : i64, tpu.core_type = #tpu.core_type<tc>, window_params = [{transform_indices = @transform_0, window_bounds = array<i64: 8, 32>}, {pipeline_mode = #tpu.pipeline_mode<synchronous>, transform_indices = @transform_1, window_bounds = array<i64: 32, 3>}, {pipeline_mode = #tpu.pipeline_mode<synchronous>, transform_indices = @transform_2, window_bounds = array<i64: 1, 3>}, {transform_indices = @transform_3, window_bounds = array<i64: 8, 3>}]} {
    %c0 = arith.constant 0 : index
    %c0_0 = arith.constant 0 : index
    %0 = vector.load %arg1[%c0, %c0_0] : memref<8x32xf32, #tpu.memory_space<vmem>>, vector<8x32xf32>
    %c0_1 = arith.constant 0 : index
    %c0_2 = arith.constant 0 : index
    %1 = vector.load %arg2[%c0_1, %c0_2] : memref<32x3xf32, #tpu.memory_space<vmem>>, vector<32x3xf32>
    %c0_3 = arith.constant 0 : index
    %c0_4 = arith.constant 0 : index
    %2 = vector.load %arg3[%c0_3, %c0_4] : memref<1x3xf32, #tpu.memory_space<vmem>>, vector<1x3xf32>
    %cst = arith.constant dense<0.000000e+00> : vector<8x3xf32>
    %3 = tpu.matmul %0, %1, %cst {dimension_numbers = #tpu.dot_dimension_numbers<[1], [0], [0], [1], [0, 0, 1, 1], [], []>} : vector<8x32xf32>, vector<32x3xf32>, vector<8x3xf32> -> vector<8x3xf32>
    %4 = vector.broadcast %2 : vector<1x3xf32> to vector<8x3xf32>
    %5 = arith.addf %3, %4 : vector<8x3xf32>
    %6 = tpu.iota {dimensions = array<i32: 1>} : vector<8x3xi32>
    %c2_i32 = arith.constant 2 : i32
    %7 = vector.broadcast %c2_i32 : i32 to vector<8x3xi32>
    %8 = arith.cmpi eq, %6, %7 : vector<8x3xi32>
    %9 = arith.negf %5 : vector<8x3xf32>
    %10 = math.exp %9 : vector<8x3xf32>
    %cst_5 = arith.constant 1.000000e+00 : f32
    %11 = vector.broadcast %cst_5 : f32 to vector<8x3xf32>
    %12 = arith.addf %11, %10 : vector<8x3xf32>
    %13 = arith.divf %11, %12 : vector<8x3xf32>
    %14 = arith.select %8, %13, %5 : vector<8x3xi1>, vector<8x3xf32>
    %c0_6 = arith.constant 0 : index
    %c0_7 = arith.constant 0 : index
    %15 = vector.load %arg4[%c0_6, %c0_7] : memref<8x3xf32, #tpu.memory_space<vmem>>, vector<8x3xf32>
    tpu.vector_store %arg4[%c0_6, %c0_7], %14 {strides = array<i32>} : memref<8x3xf32, #tpu.memory_space<vmem>>, vector<8x3xf32>,
    return
  }
  func.func @transform_0(%arg0: i32) -> (i32, i32) {
    %c0_i32 = arith.constant 0 : i32
    %c0_i32_0 = arith.constant 0 : i32
    return %arg0, %c0_i32 : i32, i32
  }
  func.func @transform_1(%arg0: i32) -> (i32, i32) {
    %c0_i32 = arith.constant 0 : i32
    %c0_i32_0 = arith.constant 0 : i32
    %c0_i32_1 = arith.constant 0 : i32
    return %c0_i32, %c0_i32_0 : i32, i32
  }
  func.func @transform_2(%arg0: i32) -> (i32, i32) {
    %c0_i32 = arith.constant 0 : i32
    %c0_i32_0 = arith.constant 0 : i32
    %c0_i32_1 = arith.constant 0 : i32
    return %c0_i32, %c0_i32_0 : i32, i32
  }
  func.func @transform_3(%arg0: i32) -> (i32, i32) {
    %c0_i32 = arith.constant 0 : i32
    %c0_i32_0 = arith.constant 0 : i32
    return %arg0, %c0_i32 : i32, i32
  }
}

</mosaic_0001>

<bundles_post_ra>
// kernel: tpu_custom_call.1
= control target key start
LH: loop header
LB: loop body
LE: loop exit
PB: predicated region body
PF: predicated region fallthrough
CT: control target
= control target key end

     0   :  { %v148_v0 = vmov 0.0|0.0   ;;  %vm149_vm0 = vmmov 0   ;;  %v150_v4 = vmov 0.0   ;;  %vm26_vm1 = vcmask 261120   ;;  %s192_s1 = inlined_call_operand.vmem [shape: f32[32,3], index: 1, kind: input, shape index: {}]   ;;  %s193_s0 = inlined_call_operand.vmem [shape: f32[8,32], index: 0, kind: input, shape index: {}]   ;;  %s194_s2 = inlined_call_operand.vmem [shape: f32[1,3], index: 2, kind: input, shape index: {}]   ;;  %s195_s3 = inlined_call_operand.vmem [shape: f32[8,3], index: 3, kind: output, shape index: {}]  }
   0x1   :  { %135 = vmatprep.subr.bf16.mxu0 %v148_v0  ;;  %v15_v1 = vld [vmem:[%s192_s1] sm:$0xff]  ;;  %v16_v2 = vld [vmem:[%s192_s1 + $0x8] sm:$0xff]  ;;  %v17_v3 = vld [vmem:[%s192_s1 + $0x10] sm:$0xff]  ;;  %132 = vmatprep.mubr.msk.f32.mxu0 %vm149_vm0, %v150_v4  ;;  %v100_v16 = vlaneseq  ;;  %vm110_vm3 = vcmask 23552  }
   0x2   :  { %v136_v5 = vpack.c.bf16 %v16_v2, %v15_v1  ;;  %v18_v6 = vld [vmem:[%s192_s1 + $0x18] sm:$0xff]  ;;  %v14_v8 = vld [vmem:[%s193_s0] sm:$0xff] }
   0x3   :  { %v139_v7 = vpack.c.bf16 %v18_v6, %v17_v3  ;;  %v116_v9 = vld [vmem:[%s194_s2] ss:$0 sm:$0xff]  ;;  %v101_v17 = vand.u32 127, %v100_v16 }
   0x4   :  { %137 = vmatpush3.bf16.msra.mxu0 %v136_v5 }
   0x5   :  { %138 = vmatprep.subr.bf16.mxu0 %v148_v0  ;;  %vm102_vm2 = vcmp.eq.s32.totalorder %v101_v17, 2 }
   0x8   :  { %140 = vmatpush3.bf16.msra.mxu0 %v139_v7 }
   0xb   :  { %133 = vmatmul.mubr.msk.f32.vlgmr.msra.gmra.mrb[0].mxu0 %vm26_vm1, %v14_v8 }
  0xde   :  { %v96_v10 = vpop.f32.mrb[0].mxu0 }
  0xdf   :  { %v97_v11 = vadd.f32 %v116_v9, %v96_v10  ;;  %v134_v12 = vpop.f32.mrb[1].mxu0 }
  0xe1   :  { %v118_v13 = vmul.f32 -1.442695, %v97_v11 }
  0xe3   :  { %144 = vpow2.f32 %v118_v13 }
  0xed   :  { %v145_v14 = vpop.eup %144 }
  0xee   :  { %v106_v15 = vadd.f32 1.0, %v145_v14 }
  0xf0   :  { %146 = vrcp.f32 %v106_v15 }
  0xfa   :  { %v147_v18 = vpop.eup %146 }
  0xfb   :  { %v109_v19 = vsel %vm102_vm2, %v147_v18, %v97_v11 }
  0xfc   :  { %111 = vst.msk [vmem:[%s195_s3] sm:$0xff] %vm110_vm3, %v109_v19 }

// kernel: tpu_custom_call.1
= control target key start
LH: loop header
LB: loop body
LE: loop exit
PB: predicated region body
PF: predicated region fallthrough
CT: control target
= control target key end

     0   :  { %v148_v0 = vmov 0.0|0.0   ;;  %vm149_vm0 = vmmov 0   ;;  %v150_v4 = vmov 0.0   ;;  %vm26_vm1 = vcmask 261120   ;;  %s192_s1 = inlined_call_operand.vmem [shape: f32[32,3], index: 1, kind: input, shape index: {}]   ;;  %s193_s0 = inlined_call_operand.vmem [shape: f32[8,32], index: 0, kind: input, shape index: {}]   ;;  %s194_s2 = inlined_call_operand.vmem [shape: f32[1,3], index: 2, kind: input, shape index: {}]   ;;  %s195_s3 = inlined_call_operand.vmem [shape: f32[8,3], index: 3, kind: output, shape index: {}]  }
   0x1   :  { %135 = vmatprep.subr.bf16.mxu0 %v148_v0  ;;  %v15_v1 = vld [vmem:[%s192_s1] sm:$0xff]  ;;  %v16_v2 = vld [vmem:[%s192_s1 + $0x8] sm:$0xff]  ;;  %v17_v3 = vld [vmem:[%s192_s1 + $0x10] sm:$0xff]  ;;  %132 = vmatprep.mubr.msk.f32.mxu0 %vm149_vm0, %v150_v4  ;;  %v100_v16 = vlaneseq  ;;  %vm110_vm3 = vcmask 23552  }
   0x2   :  { %v136_v5 = vpack.c.bf16 %v16_v2, %v15_v1  ;;  %v18_v6 = vld [vmem:[%s192_s1 + $0x18] sm:$0xff]  ;;  %v14_v8 = vld [vmem:[%s193_s0] sm:$0xff] }
   0x3   :  { %v139_v7 = vpack.c.bf16 %v18_v6, %v17_v3  ;;  %v116_v9 = vld [vmem:[%s194_s2] ss:$0 sm:$0xff]  ;;  %v101_v17 = vand.u32 127, %v100_v16 }
   0x4   :  { %137 = vmatpush3.bf16.msra.mxu0 %v136_v5 }
   0x5   :  { %138 = vmatprep.subr.bf16.mxu0 %v148_v0  ;;  %vm102_vm2 = vcmp.eq.s32.totalorder %v101_v17, 2 }
   0x8   :  { %140 = vmatpush3.bf16.msra.mxu0 %v139_v7 }
   0xb   :  { %133 = vmatmul.mubr.msk.f32.vlgmr.msra.gmra.mrb[0].mxu0 %vm26_vm1, %v14_v8 }
  0xde   :  { %v96_v10 = vpop.f32.mrb[0].mxu0 }
  0xdf   :  { %v97_v11 = vadd.f32 %v116_v9, %v96_v10  ;;  %v134_v12 = vpop.f32.mrb[1].mxu0 }
  0xe1   :  { %v118_v13 = vmul.f32 -1.442695, %v97_v11 }
  0xe3   :  { %144 = vpow2.f32 %v118_v13 }
  0xed   :  { %v145_v14 = vpop.eup %144 }
  0xee   :  { %v106_v15 = vadd.f32 1.0, %v145_v14 }
  0xf0   :  { %146 = vrcp.f32 %v106_v15 }
  0xfa   :  { %v147_v18 = vpop.eup %146 }
  0xfb   :  { %v109_v19 = vsel %vm102_vm2, %v147_v18, %v97_v11 }
  0xfc   :  { %111 = vst.msk [vmem:[%s195_s3] sm:$0xff] %vm110_vm3, %v109_v19 }

</bundles_post_ra>
